<compile_context>
chip_gen: v6e
topology: v6e:2x2x1
jax: 0.10.0
libtpu: 0.0.40
codegen_flags: <defaults>
</compile_context>

<pallas_src>
import functools

import jax
import jax.numpy as jnp
from jax import lax
from jax.experimental import pallas as pl
from jax.experimental.pallas import tpu as pltpu


_LANES = 512          # lane-dense last dim (multiple of 128)
_MAX_TILE_ROWS = 512  # (512, 512) f32 tile = 1 MiB; in+out double-buffered = 4 MiB


def _as_i32(v: int) -> int:
    """Reinterpret an unsigned 32-bit constant as a Python int in int32 range."""
    v &= 0xFFFFFFFF
    return v - (1 << 32) if v >= (1 << 31) else v


_GOLDEN = _as_i32(0x9E3779B9)   # seed scrambling increment (golden ratio)
_MIX_M1 = _as_i32(0x21F0AAAD)   # lowbias32 multipliers (Wellons)
_MIX_M2 = _as_i32(0xD35A2D97)


def _round_up(v: int, m: int) -> int:
    return (v + m - 1) // m * m


def _gaussian_noise_kernel(seed_ref, x_ref, o_ref, *, sigma):
    rows, lanes = x_ref.shape          # static tile shape
    tile_elems = rows * lanes

    # Per-element counter = global element index, combined with the seed.
    # All int32 arithmetic (wraps mod 2^32), runs entirely on the VPU.
    seed = seed_ref[0]
    base = pl.program_id(0) * tile_elems + seed * _GOLDEN

    row = lax.broadcasted_iota(jnp.int32, (rows, lanes), 0)
    col = lax.broadcasted_iota(jnp.int32, (rows, lanes), 1)
    h = row * lanes + col + base

    # lowbias32 integer mixer; (x >> k) & mask == logical right shift on int32.
    h = h ^ ((h >> 16) & 0xFFFF)
    h = h * _MIX_M1
    h = h ^ ((h >> 15) & 0x1FFFF)
    h = h * _MIX_M2
    h = h ^ ((h >> 15) & 0x1FFFF)

    # Top 24 bits -> uniform strictly inside (0, 1).
    u = ((h >> 8) & 0xFFFFFF).astype(jnp.float32) * (2.0 ** -24) + (2.0 ** -25)

    # z ~ N(0, 1) via inverse error function (one transcendental per element).
    z = 1.4142135623730951 * lax.erf_inv(2.0 * u - 1.0)

    o_ref[...] = x_ref[...] + (sigma * z).astype(x_ref.dtype)


def gaussian_noise_transform(x, seed: int, sigma: float = 0.05):
    """out = x + N(0, sigma^2) noise, elementwise, same shape/dtype as x."""
    # TODO(synk): integer-dtype inputs would need torch-style float promotion;
    # this kernel assumes a floating-point tensor (as BYOL's transforms use).
    orig_shape = x.shape
    total = x.size

    # Lane-dense slab: flatten, pad to (rows_p, 512), tile by (tile_rows, 512).
    rows = _round_up(total, _LANES) // _LANES
    tile_rows = min(_MAX_TILE_ROWS, _round_up(rows, 8))
    rows_p = _round_up(rows, tile_rows)
    pad = rows_p * _LANES - total

    flat = x.reshape(-1)
    if pad:
        flat = jnp.pad(flat, (0, pad))
    x2d = flat.reshape(rows_p, _LANES)

    seed_arr = jnp.asarray([seed], dtype=jnp.int32)
    grid = (rows_p // tile_rows,)

    out2d = pl.pallas_call(
        functools.partial(_gaussian_noise_kernel, sigma=float(sigma)),
        out_shape=jax.ShapeDtypeStruct(x2d.shape, x2d.dtype),
        grid_spec=pltpu.PrefetchScalarGridSpec(
            num_scalar_prefetch=1,                      # seed scalar -> SMEM
            grid=grid,
            in_specs=[pl.BlockSpec((tile_rows, _LANES), lambda i, _s: (i, 0))],
            out_specs=pl.BlockSpec((tile_rows, _LANES), lambda i, _s: (i, 0)),
        ),
        # x2d is input operand 1 (after the scalar-prefetch seed); alias it to
        # the output so no second HBM buffer is allocated.
        input_output_aliases={1: 0},
        compiler_params=pltpu.CompilerParams(
            dimension_semantics=("parallel",),          # shard across TCs (v7x)
        ),
    )(seed_arr, x2d)

    out = out2d.reshape(-1)
    if pad:
        out = out[:total]
    return out.reshape(orig_shape)


if __name__ == "__main__":
    key = jax.random.PRNGKey(0)
    # Small NCHW-shaped input, consistent with a generic tensor transform.
    x = jax.random.normal(key, (2, 4, 16, 16), dtype=jnp.float32)

    out = gaussian_noise_transform(x, seed=1234, sigma=0.05)
    out = jax.block_until_ready(out)

    assert out.shape == x.shape and out.dtype == x.dtype

    noise = out - x
    max_dev = float(jnp.max(jnp.abs(noise)))
    mean = float(jnp.mean(noise))
    std = float(jnp.std(noise))
    # Light sanity checks on the added Gaussian noise.
    assert max_dev < 0.05 * 8.0, f"noise magnitude looks wrong: {max_dev}"
    assert abs(mean) < 0.01, f"noise mean looks wrong: {mean}"
    assert 0.03 < std < 0.07, f"noise std looks wrong: {std}"

    print("KERNEL_OK")
</pallas_src>

<mosaic_0001>
module attributes {stable_mosaic.version = 11 : i64} {
  func.func @_gaussian_noise_kernel(%arg0: i32, %arg1: memref<1xi32, #tpu.memory_space<smem>>, %arg2: memref<8x512xf32, #tpu.memory_space<vmem>>, %arg3: memref<8x512xf32, #tpu.memory_space<vmem>>) attributes {dimension_semantics = [#tpu.dimension_semantics<parallel>], iteration_bounds = array<i64: 1>, scalar_prefetch = 1 : i64, scratch_operands = 0 : i64, tpu.core_type = #tpu.core_type<tc>, window_params = [{transform_indices = @transform_0, window_bounds = array<i64: 8, 512>}, {transform_indices = @transform_1, window_bounds = array<i64: 8, 512>}]} {
    %c0 = arith.constant 0 : index
    %0 = memref.load %arg1[%c0] : memref<1xi32, #tpu.memory_space<smem>>
    %c4096_i32 = arith.constant 4096 : i32
    %1 = arith.muli %arg0, %c4096_i32 : i32
    %c-1640531527_i32 = arith.constant -1640531527 : i32
    %2 = arith.muli %0, %c-1640531527_i32 : i32
    %3 = arith.addi %1, %2 : i32
    %4 = tpu.iota {dimensions = array<i32: 0>} : vector<8x512xi32>
    %5 = tpu.iota {dimensions = array<i32: 1>} : vector<8x512xi32>
    %c512_i32 = arith.constant 512 : i32
    %6 = vector.broadcast %c512_i32 : i32 to vector<8x512xi32>
    %7 = arith.muli %4, %6 : vector<8x512xi32>
    %8 = arith.addi %7, %5 : vector<8x512xi32>
    %9 = vector.broadcast %3 : i32 to vector<8x512xi32>
    %10 = arith.addi %8, %9 : vector<8x512xi32>
    %c16_i32 = arith.constant 16 : i32
    %11 = vector.broadcast %c16_i32 : i32 to vector<8x512xi32>
    %12 = arith.shrsi %10, %11 : vector<8x512xi32>
    %c65535_i32 = arith.constant 65535 : i32
    %13 = vector.broadcast %c65535_i32 : i32 to vector<8x512xi32>
    %14 = arith.andi %12, %13 : vector<8x512xi32>
    %15 = arith.xori %10, %14 : vector<8x512xi32>
    %c569420461_i32 = arith.constant 569420461 : i32
    %16 = vector.broadcast %c569420461_i32 : i32 to vector<8x512xi32>
    %17 = arith.muli %15, %16 : vector<8x512xi32>
    %c15_i32 = arith.constant 15 : i32
    %18 = vector.broadcast %c15_i32 : i32 to vector<8x512xi32>
    %19 = arith.shrsi %17, %18 : vector<8x512xi32>
    %c131071_i32 = arith.constant 131071 : i32
    %20 = vector.broadcast %c131071_i32 : i32 to vector<8x512xi32>
    %21 = arith.andi %19, %20 : vector<8x512xi32>
    %22 = arith.xori %17, %21 : vector<8x512xi32>
    %c-749064809_i32 = arith.constant -749064809 : i32
    %23 = vector.broadcast %c-749064809_i32 : i32 to vector<8x512xi32>
    %24 = arith.muli %22, %23 : vector<8x512xi32>
    %c15_i32_0 = arith.constant 15 : i32
    %25 = vector.broadcast %c15_i32_0 : i32 to vector<8x512xi32>
    %26 = arith.shrsi %24, %25 : vector<8x512xi32>
    %c131071_i32_1 = arith.constant 131071 : i32
    %27 = vector.broadcast %c131071_i32_1 : i32 to vector<8x512xi32>
    %28 = arith.andi %26, %27 : vector<8x512xi32>
    %29 = arith.xori %24, %28 : vector<8x512xi32>
    %c8_i32 = arith.constant 8 : i32
    %30 = vector.broadcast %c8_i32 : i32 to vector<8x512xi32>
    %31 = arith.shrsi %29, %30 : vector<8x512xi32>
    %c16777215_i32 = arith.constant 16777215 : i32
    %32 = vector.broadcast %c16777215_i32 : i32 to vector<8x512xi32>
    %33 = arith.andi %31, %32 : vector<8x512xi32>
    %34 = arith.sitofp %33 : vector<8x512xi32> to vector<8x512xf32>
    %cst = arith.constant 5.96046448E-8 : f32
    %35 = vector.broadcast %cst : f32 to vector<8x512xf32>
    %36 = arith.mulf %34, %35 : vector<8x512xf32>
    %cst_2 = arith.constant 2.98023224E-8 : f32
    %37 = vector.broadcast %cst_2 : f32 to vector<8x512xf32>
    %38 = arith.addf %36, %37 : vector<8x512xf32>
    %cst_3 = arith.constant 2.000000e+00 : f32
    %39 = vector.broadcast %cst_3 : f32 to vector<8x512xf32>
    %40 = arith.mulf %39, %38 : vector<8x512xf32>
    %cst_4 = arith.constant 1.000000e+00 : f32
    %41 = vector.broadcast %cst_4 : f32 to vector<8x512xf32>
    %42 = arith.subf %40, %41 : vector<8x512xf32>
    %cst_5 = arith.constant 0.000000e+00 : f32
    %43 = vector.broadcast %cst_5 : f32 to vector<8x512xf32>
    %44 = arith.subf %43, %42 : vector<8x512xf32>
    %45 = arith.mulf %42, %44 : vector<8x512xf32>
    %46 = math.log1p %45 : vector<8x512xf32>
    %cst_6 = arith.constant 0.000000e+00 : f32
    %47 = vector.broadcast %cst_6 : f32 to vector<8x512xf32>
    %48 = arith.subf %47, %46 : vector<8x512xf32>
    %cst_7 = arith.constant 5.000000e+00 : f32
    %49 = vector.broadcast %cst_7 : f32 to vector<8x512xf32>
    %50 = arith.cmpf olt, %48, %49 : vector<8x512xf32>
    %cst_8 = arith.constant 2.500000e+00 : f32
    %51 = vector.broadcast %cst_8 : f32 to vector<8x512xf32>
    %52 = arith.subf %48, %51 : vector<8x512xf32>
    %53 = math.sqrt %48 : vector<8x512xf32>
    %cst_9 = arith.constant 3.000000e+00 : f32
    %54 = vector.broadcast %cst_9 : f32 to vector<8x512xf32>
    %55 = arith.subf %53, %54 : vector<8x512xf32>
    %56 = arith.select %50, %52, %55 : vector<8x512xi1>, vector<8x512xf32>
    %cst_10 = arith.constant 2.81022636E-8 : f32
    %cst_11 = arith.constant -2.00214257E-4 : f32
    %57 = vector.broadcast %cst_10 : f32 to vector<8x512xf32>
    %58 = vector.broadcast %cst_11 : f32 to vector<8x512xf32>
    %59 = arith.select %50, %57, %58 : vector<8x512xi1>, vector<8x512xf32>
    %cst_12 = arith.constant 3.43273939E-7 : f32
    %cst_13 = arith.constant 1.00950558E-4 : f32
    %60 = vector.broadcast %cst_12 : f32 to vector<8x512xf32>
    %61 = vector.broadcast %cst_13 : f32 to vector<8x512xf32>
    %62 = arith.select %50, %60, %61 : vector<8x512xi1>, vector<8x512xf32>
    %63 = arith.mulf %59, %56 : vector<8x512xf32>
    %64 = arith.addf %62, %63 : vector<8x512xf32>
    %cst_14 = arith.constant -3.5233877E-6 : f32
    %cst_15 = arith.constant 0.00134934322 : f32
    %65 = vector.broadcast %cst_14 : f32 to vector<8x512xf32>
    %66 = vector.broadcast %cst_15 : f32 to vector<8x512xf32>
    %67 = arith.select %50, %65, %66 : vector<8x512xi1>, vector<8x512xf32>
    %68 = arith.mulf %64, %56 : vector<8x512xf32>
    %69 = arith.addf %67, %68 : vector<8x512xf32>
    %cst_16 = arith.constant -4.39150654E-6 : f32
    %cst_17 = arith.constant -0.00367342844 : f32
    %70 = vector.broadcast %cst_16 : f32 to vector<8x512xf32>
    %71 = vector.broadcast %cst_17 : f32 to vector<8x512xf32>
    %72 = arith.select %50, %70, %71 : vector<8x512xi1>, vector<8x512xf32>
    %73 = arith.mulf %69, %56 : vector<8x512xf32>
    %74 = arith.addf %72, %73 : vector<8x512xf32>
    %cst_18 = arith.constant 2.1858087E-4 : f32
    %cst_19 = arith.constant 0.00573950773 : f32
    %75 = vector.broadcast %cst_18 : f32 to vector<8x512xf32>
    %76 = vector.broadcast %cst_19 : f32 to vector<8x512xf32>
    %77 = arith.select %50, %75, %76 : vector<8x512xi1>, vector<8x512xf32>
    %78 = arith.mulf %74, %56 : vector<8x512xf32>
    %79 = arith.addf %77, %78 : vector<8x512xf32>
    %cst_20 = arith.constant -0.00125372503 : f32
    %cst_21 = arith.constant -0.0076224613 : f32
    %80 = vector.broadcast %cst_20 : f32 to vector<8x512xf32>
    %81 = vector.broadcast %cst_21 : f32 to vector<8x512xf32>
    %82 = arith.select %50, %80, %81 : vector<8x512xi1>, vector<8x512xf32>
    %83 = arith.mulf %79, %56 : vector<8x512xf32>
    %84 = arith.addf %82, %83 : vector<8x512xf32>
    %cst_22 = arith.constant -0.00417768164 : f32
    %cst_23 = arith.constant 0.00943887047 : f32
    %85 = vector.broadcast %cst_22 : f32 to vector<8x512xf32>
    %86 = vector.broadcast %cst_23 : f32 to vector<8x512xf32>
    %87 = arith.select %50, %85, %86 : vector<8x512xi1>, vector<8x512xf32>
    %88 = arith.mulf %84, %56 : vector<8x512xf32>
    %89 = arith.addf %87, %88 : vector<8x512xf32>
    %cst_24 = arith.constant 0.246640727 : f32
    %cst_25 = arith.constant 1.00167406 : f32
    %90 = vector.broadcast %cst_24 : f32 to vector<8x512xf32>
    %91 = vector.broadcast %cst_25 : f32 to vector<8x512xf32>
    %92 = arith.select %50, %90, %91 : vector<8x512xi1>, vector<8x512xf32>
    %93 = arith.mulf %89, %56 : vector<8x512xf32>
    %94 = arith.addf %92, %93 : vector<8x512xf32>
    %cst_26 = arith.constant 1.50140941 : f32
    %cst_27 = arith.constant 2.83297682 : f32
    %95 = vector.broadcast %cst_26 : f32 to vector<8x512xf32>
    %96 = vector.broadcast %cst_27 : f32 to vector<8x512xf32>
    %97 = arith.select %50, %95, %96 : vector<8x512xi1>, vector<8x512xf32>
    %98 = arith.mulf %94, %56 : vector<8x512xf32>
    %99 = arith.addf %97, %98 : vector<8x512xf32>
    %100 = math.absf %42 : vector<8x512xf32>
    %cst_28 = arith.constant 1.000000e+00 : f32
    %101 = vector.broadcast %cst_28 : f32 to vector<8x512xf32>
    %102 = arith.cmpf oeq, %100, %101 : vector<8x512xf32>
    %cst_29 = arith.constant 0x7F800000 : f32
    %103 = vector.broadcast %cst_29 : f32 to vector<8x512xf32>
    %104 = arith.mulf %103, %42 : vector<8x512xf32>
    %105 = arith.mulf %99, %42 : vector<8x512xf32>
    %106 = arith.select %102, %104, %105 : vector<8x512xi1>, vector<8x512xf32>
    %cst_30 = arith.constant 1.41421354 : f32
    %107 = vector.broadcast %cst_30 : f32 to vector<8x512xf32>
    %108 = arith.mulf %107, %106 : vector<8x512xf32>
    %c0_31 = arith.constant 0 : index
    %c0_32 = arith.constant 0 : index
    %109 = vector.load %arg2[%c0_31, %c0_32] : memref<8x512xf32, #tpu.memory_space<vmem>>, vector<8x512xf32>
    %cst_33 = arith.constant 5.000000e-02 : f32
    %110 = vector.broadcast %cst_33 : f32 to vector<8x512xf32>
    %111 = arith.mulf %110, %108 : vector<8x512xf32>
    %112 = arith.addf %109, %111 : vector<8x512xf32>
    %c0_34 = arith.constant 0 : index
    %c0_35 = arith.constant 0 : index
    %113 = vector.load %arg3[%c0_34, %c0_35] : memref<8x512xf32, #tpu.memory_space<vmem>>, vector<8x512xf32>
    tpu.vector_store %arg3[%c0_34, %c0_35], %112 {strides = array<i32>} : memref<8x512xf32, #tpu.memory_space<vmem>>, vector<8x512xf32>,
    return
  }
  func.func @transform_0(%arg0: i32, %arg1: memref<1xi32, #tpu.memory_space<smem>>) -> (i32, i32) {
    %c0_i32 = arith.constant 0 : i32
    %c0_i32_0 = arith.constant 0 : i32
    return %arg0, %c0_i32 : i32, i32
  }
  func.func @transform_1(%arg0: i32, %arg1: memref<1xi32, #tpu.memory_space<smem>>) -> (i32, i32) {
    %c0_i32 = arith.constant 0 : i32
    %c0_i32_0 = arith.constant 0 : i32
    return %arg0, %c0_i32 : i32, i32
  }
}

</mosaic_0001>

<bundles_post_ra>
// kernel: tpu_custom_call.1
= control target key start
LH: loop header
LB: loop body
LE: loop exit
PB: predicated region body
PF: predicated region fallthrough
CT: control target
= control target key end

     0   :  { %8 = vsyncpa [#allocation5], 0  ;;  %s693_s0 = inlined_call_operand.<no memory space> [shape: s32[1], index: 0, kind: input, shape index: {}]   ;;  %s694_s1 = inlined_call_operand.hbm [shape: f32[8,512], index: 1, kind: input, shape index: {}, may-alias: {1,2}]   ;;  %s695_s2 = inlined_call_operand.hbm [shape: f32[8,512], index: 2, kind: output, shape index: {}, may-alias: {1,2}]  }
   0x1   :  { %9 = vsyncpa [#allocation6], 0  ;;  %s462_s9 = smov [#allocation4]  }
   0x2   :  { %s16_s10 = sshll.u32 %s462_s9, 4  ;;  %s17_s10 = int_to_ptr.vmem [resolvable:$true] %s16_s10 }
   0x3   :  { %s426_s11 = scalar_lea.vmem %s17_s10, 512  ;;  %p431_p1 = scmp.lt.s32.totalorder %s17_s10, %s17_s10 }
   0x4   :  { %p427_p0 = scmp.ne.s32.totalorder %s17_s10, %s426_s11  ;;  %p432_p2 = scmp.lt.s32.totalorder %s426_s11, %s426_s11 }
   0x6   :  { %p433_p3 = por %p432_p2, %p431_p1 }
   0x8   :  { %p434_p4 = pnand %p433_p3, %p427_p0 }
   0xa   :  { %437 = shalt.err (!%p434_p4)
}
   0xb   :  { %19 = dma.hbm_to_vmem [thread:$0]  %s694_s1, 512, %s17_s10, [#allocation5]  }
   0xc   :  { %458 = dma.done.wait [#allocation5], 512  }
   0xd   :  { %459 = vsyncadd [#allocation5], 4294966784  ;;  %v27_v0 = vlaneseq  ;;  %s25_s16 = smul.u32 2654435769, %s693_s0  ;;  %s472_s0 = smov [#allocation7]  }
   0xe   :  { %s354_s1 = sshll.u32 %s472_s0, 4  ;;  %s355_s1 = int_to_ptr.vmem [resolvable:$true] %s354_s1 }
   0xf   :  { %v28_v1 = vshrl.u32 %v27_v0, 7  ;;  %v30_v2 = vand.u32 127, %v27_v0  ;;  %v39_v6 = vstv %s25_s16  ;;  %s438_s17 = scalar_lea.vmem %s355_s1, 512  ;;  %p443_p6 = scmp.lt.s32.totalorder %s355_s1, %s355_s1 }
  0x10   :  { %p439_p5 = scmp.ne.s32.totalorder %s355_s1, %s438_s17  ;;  %p444_p7 = scmp.lt.s32.totalorder %s438_s17, %s438_s17 }
  0x11   :  { %v34_v3 = vmul.u32 512, %v28_v1  ;;  %v31_v4 = vadd.s32 128, %v30_v2  ;;  %v32_v5 = vadd.s32 256, %v30_v2  ;;  %v33_v7 = vadd.s32 384, %v30_v2 }
  0x12   :  { %p445_p8 = por %p444_p7, %p443_p6 }
  0x13   :  { %v35_v8 = vadd.s32 %v34_v3, %v30_v2  ;;  %v36_v9 = vadd.s32 %v34_v3, %v31_v4  ;;  %v37_v10 = vadd.s32 %v34_v3, %v32_v5  ;;  %v38_v11 = vadd.s32 %v34_v3, %v33_v7 }
  0x14   :  { %p446_p9 = pnand %p445_p8, %p439_p5 }
  0x15   :  { %v40_v12 = vadd.s32 %v39_v6, %v35_v8  ;;  %v41_v13 = vadd.s32 %v39_v6, %v36_v9  ;;  %v42_v14 = vadd.s32 %v39_v6, %v37_v10  ;;  %v43_v15 = vadd.s32 %v39_v6, %v38_v11 }
  0x17   :  { %v363_v16 = vshrl.u32 %v40_v12, 16  ;;  %v364_v17 = vshrl.u32 %v41_v13, 16  ;;  %v365_v18 = vshrl.u32 %v42_v14, 16  ;;  %v366_v19 = vshrl.u32 %v43_v15, 16 }
  0x19   :  { %v52_v20 = vxor.u32 %v363_v16, %v40_v12  ;;  %v53_v21 = vxor.u32 %v364_v17, %v41_v13  ;;  %v54_v22 = vxor.u32 %v365_v18, %v42_v14  ;;  %v55_v23 = vxor.u32 %v366_v19, %v43_v15 }
  0x1b   :  { %v56_v24 = vmul.u32 569420461, %v52_v20  ;;  %v57_v25 = vmul.u32 569420461, %v53_v21 }
  0x1c   :  { %v58_v26 = vmul.u32 569420461, %v54_v22  ;;  %v59_v27 = vmul.u32 569420461, %v55_v23 }
  0x1d   :  { %v367_v28 = vshrl.u32 %v56_v24, 15  ;;  %v368_v29 = vshrl.u32 %v57_v25, 15 }
  0x1e   :  { %v369_v30 = vshrl.u32 %v58_v26, 15  ;;  %v370_v31 = vshrl.u32 %v59_v27, 15 }
  0x1f   :  { %v68_v32 = vxor.u32 %v367_v28, %v56_v24  ;;  %v69_v33 = vxor.u32 %v368_v29, %v57_v25 }
  0x20   :  { %v70_v34 = vxor.u32 %v369_v30, %v58_v26  ;;  %v71_v35 = vxor.u32 %v370_v31, %v59_v27 }
  0x21   :  { %v72_v36 = vmul.u32 3545902487, %v68_v32  ;;  %v73_v37 = vmul.u32 3545902487, %v69_v33 }
  0x22   :  { %v74_v38 = vmul.u32 3545902487, %v70_v34  ;;  %v75_v39 = vmul.u32 3545902487, %v71_v35 }
  0x23   :  { %v371_v40 = vshrl.u32 %v72_v36, 15  ;;  %v372_v41 = vshrl.u32 %v73_v37, 15 }
  0x24   :  { %v373_v42 = vshrl.u32 %v74_v38, 15  ;;  %v374_v43 = vshrl.u32 %v75_v39, 15 }
  0x25   :  { %v84_v44 = vxor.u32 %v371_v40, %v72_v36  ;;  %v85_v45 = vxor.u32 %v372_v41, %v73_v37 }
  0x26   :  { %v86_v46 = vxor.u32 %v373_v42, %v74_v38  ;;  %v87_v47 = vxor.u32 %v374_v43, %v75_v39 }
  0x27   :  { %v375_v48 = vshrl.u32 %v84_v44, 8  ;;  %v376_v49 = vshrl.u32 %v85_v45, 8 }
  0x28   :  { %v377_v50 = vshrl.u32 %v86_v46, 8  ;;  %v378_v51 = vshrl.u32 %v87_v47, 8 }
  0x29   :  { %v96_v52 = vcvt.s32.f32 %v375_v48  ;;  %v97_v53 = vcvt.s32.f32 %v376_v49 }
  0x2a   :  { %v98_v54 = vcvt.s32.f32 %v377_v50  ;;  %v99_v55 = vcvt.s32.f32 %v378_v51 }
  0x2b   :  { %v100_v56 = vmul.f32 5.9604645e-08, %v96_v52  ;;  %v101_v57 = vmul.f32 5.9604645e-08, %v97_v53 }
  0x2c   :  { %v102_v58 = vmul.f32 5.9604645e-08, %v98_v54  ;;  %v103_v59 = vmul.f32 5.9604645e-08, %v99_v55 }
  0x2d   :  { %v104_v60 = vadd.f32 2.9802322e-08, %v100_v56  ;;  %v105_v61 = vadd.f32 2.9802322e-08, %v101_v57 }
  0x2e   :  { %v106_v62 = vadd.f32 2.9802322e-08, %v102_v58  ;;  %v107_v63 = vadd.f32 2.9802322e-08, %v103_v59 }
  0x2f   :  { %v108_v0 = vmul.f32 2.0, %v104_v60  ;;  %v109_v1 = vmul.f32 2.0, %v105_v61 }
  0x30   :  { %v110_v2 = vmul.f32 2.0, %v106_v62  ;;  %v111_v3 = vmul.f32 2.0, %v107_v63  ;;  %v463_v62 = vmov -0.00020021426  }
  0x31   :  { %v494_v4 = vadd.f32 -1.0, %v108_v0  ;;  %v496_v5 = vadd.f32 -1.0, %v109_v1 }
  0x32   :  { %v498_v6 = vadd.f32 -1.0, %v110_v2  ;;  %v503_v10 = vadd.f32 -1.0, %v111_v3 }
  0x33   :  { %v116_v7 = vsub.f32 0.0, %v494_v4  ;;  %v117_v8 = vsub.f32 0.0, %v496_v5 }
  0x34   :  { %v118_v9 = vsub.f32 0.0, %v498_v6  ;;  %v119_v16 = vsub.f32 0.0, %v503_v10 }
  0x35   :  { %v120_v11 = vmul.f32 %v494_v4, %v116_v7  ;;  %v121_v12 = vmul.f32 %v496_v5, %v117_v8  ;;  %v464_v7 = vmov 0.00010095056  }
  0x36   :  { %v122_v13 = vmul.f32 %v498_v6, %v118_v9  ;;  %v123_v18 = vmul.f32 %v503_v10, %v119_v16 }
  0x37   :  { %v124_v14 = vadd.f32 1.0, %v120_v11  ;;  %v133_v15 = vadd.f32 1.0, %v121_v12  ;;  %v127_v19 = vmul.f32 -0.5, %v120_v11  ;;  %v136_v20 = vmul.f32 -0.5, %v121_v12 }
  0x38   :  { %v142_v17 = vadd.f32 1.0, %v122_v13  ;;  %v151_v21 = vadd.f32 1.0, %v123_v18  ;;  %v130_v23 = vand.u32 2147483647, %v120_v11  ;;  %v139_v25 = vand.u32 2147483647, %v121_v12 }
  0x39   :  { %402 = vlog2.f32 %v124_v14  ;;  %v128_v22 = vadd.f32 1.0, %v127_v19  ;;  %v137_v24 = vadd.f32 1.0, %v136_v20  ;;  %v145_v27 = vmul.f32 -0.5, %v122_v13 }
  0x3a   :  { %404 = vlog2.f32 %v133_v15  ;;  %vm131_vm0 = vcmp.lt.f32.partialorder %v130_v23, 0.0004427343  ;;  %vm140_vm1 = vcmp.lt.f32.partialorder %v139_v25, 0.0004427343  ;;  %v148_v38 = vand.u32 2147483647, %v122_v13 }
  0x3b   :  { %406 = vlog2.f32 %v142_v17  ;;  %v129_v26 = vmul.f32 %v128_v22, %v120_v11  ;;  %v138_v29 = vmul.f32 %v137_v24, %v121_v12  ;;  %v146_v34 = vadd.f32 1.0, %v145_v27 }
  0x3c   :  { %408 = vlog2.f32 %v151_v21  ;;  %v154_v40 = vmul.f32 -0.5, %v123_v18  ;;  %vm149_vm2 = vcmp.lt.f32.partialorder %v148_v38, 0.0004427343  ;;  %v157_v46 = vand.u32 2147483647, %v123_v18 }
  0x3d   :  { %v147_v42 = vmul.f32 %v146_v34, %v122_v13  ;;  %v465_v19 = vmov 0.0013493432  }
  0x3e   :  { %v155_v43 = vadd.f32 1.0, %v154_v40  ;;  %vm158_vm3 = vcmp.lt.f32.partialorder %v157_v46, 0.0004427343 }
  0x40   :  { %v156_v49 = vmul.f32 %v155_v43, %v123_v18 }
  0x46   :  { %v403_v28 = vpop.eup %402 }
  0x47   :  { %v405_v30 = vpop.eup %404  ;;  %v126_v31 = vmul.f32 0.6931472, %v403_v28  ;;  %v466_v28 = vmov -0.0036734284  }
  0x48   :  { %v135_v32 = vmul.f32 0.6931472, %v405_v30  ;;  %v407_v35 = vpop.eup %406 }
  0x49   :  { %v132_v33 = vsel %vm131_vm0, %v129_v26, %v126_v31  ;;  %v144_v41 = vmul.f32 0.6931472, %v407_v35  ;;  %v409_v44 = vpop.eup %408 }
  0x4a   :  { %v510_v36 = vsub.f32 0.0, %v132_v33  ;;  %v141_v37 = vsel %vm140_vm1, %v138_v29, %v135_v32  ;;  %v153_v48 = vmul.f32 0.6931472, %v409_v44 }
  0x4b   :  { %v512_v39 = vsub.f32 0.0, %v141_v37  ;;  %v150_v45 = vsel %vm149_vm2, %v147_v42, %v144_v41 }
  0x4c   :  { %410 = vrsqrt.f32 %v510_v36  ;;  %v516_v47 = vsub.f32 0.0, %v150_v45  ;;  %v159_v50 = vsel %vm158_vm3, %v156_v49, %v153_v48  ;;  %vm174_vm4 = vcmp.eq.f32.partialorder %v510_v36, inf }
  0x4d   :  { %412 = vrsqrt.f32 %v512_v39  ;;  %v177_v52 = vand.u32 2147483648, %v510_v36  ;;  %vm176_vm5 = vcmp.eq.f32.partialorder %v510_v36, 0.0  ;;  %v523_v54 = vsub.f32 0.0, %v159_v50 }
  0x4e   :  { %414 = vrsqrt.f32 %v516_v47  ;;  %vm164_vm6 = vcmp.lt.f32.partialorder %v510_v36, 5.0  ;;  %vm181_vm7 = vcmp.eq.f32.partialorder %v512_v39, inf  ;;  %v184_v56 = vand.u32 2147483648, %v512_v39 }
  0x4f   :  { %v383_v57 = vadd.f32 -2.5, %v510_v36  ;;  %vm183_vm8 = vcmp.eq.f32.partialorder %v512_v39, 0.0  ;;  %vm165_vm9 = vcmp.lt.f32.partialorder %v512_v39, 5.0  ;;  %416 = vrsqrt.f32 %v523_v54 }
  0x50   :  { %v208_v63 = vsel %vm164_vm6, 2.8102264e-08, %v463_v62  ;;  %v384_v0 = vadd.f32 -2.5, %v512_v39  ;;  %v212_v8 = vsel %vm164_vm6, 3.4327394e-07, %v464_v7  ;;  %vm188_vm10 = vcmp.eq.f32.partialorder %v516_v47, inf }
  0x51   :  { %v209_v11 = vsel %vm165_vm9, 2.8102264e-08, %v463_v62  ;;  %v213_v14 = vsel %vm165_vm9, 3.4327394e-07, %v464_v7  ;;  %v191_v18 = vand.u32 2147483648, %v516_v47  ;;  %vm190_vm11 = vcmp.eq.f32.partialorder %v516_v47, 0.0 }
  0x52   :  { %v224_v20 = vsel %vm164_vm6, -3.5233877e-06, %v465_v19  ;;  %vm166_vm12 = vcmp.lt.f32.partialorder %v516_v47, 5.0  ;;  %v225_v24 = vsel %vm165_vm9, -3.5233877e-06, %v465_v19  ;;  %v385_v25 = vadd.f32 -2.5, %v516_v47 }
  0x53   :  { %v236_v29 = vsel %vm164_vm6, -4.3915065e-06, %v466_v28  ;;  %v237_v32 = vsel %vm165_vm9, -4.3915065e-06, %v466_v28  ;;  %v210_v34 = vsel %vm166_vm12, 2.8102264e-08, %v463_v62 }
  0x54   :  { %v214_v38 = vsel %vm166_vm12, 3.4327394e-07, %v464_v7  ;;  %vm167_vm13 = vcmp.lt.f32.partialorder %v523_v54, 5.0  ;;  %vm195_vm14 = vcmp.eq.f32.partialorder %v523_v54, inf  ;;  %vm197_vm15 = vcmp.eq.f32.partialorder %v523_v54, 0.0 }
  0x55   :  { %v198_v42 = vand.u32 2147483648, %v523_v54  ;;  %v467_v48 = vmov 0.0057395077   ;;  %v386_v50 = vadd.f32 -2.5, %v523_v54 }
  0x56   :  { %v248_v49 = vsel %vm164_vm6, 0.00021858087, %v467_v48 }
  0x59   :  { %v411_v51 = vpop.eup %410 }
  0x5a   :  { %v173_v53 = vmul.f32 %v411_v51, %v510_v36  ;;  %v413_v55 = vpop.eup %412 }
  0x5b   :  { %v180_v59 = vmul.f32 %v413_v55, %v512_v39  ;;  %v415_v15 = vpop.eup %414 }
  0x5c   :  { %v175_v58 = vsel %vm174_vm4, %v510_v36, %v173_v53  ;;  %v187_v21 = vmul.f32 %v415_v15, %v516_v47  ;;  %v417_v40 = vpop.eup %416  ;;  %v238_v15 = vsel %vm166_vm12, -4.3915065e-06, %v466_v28 }
  0x5d   :  { %v178_v60 = vsel %vm176_vm5, %v177_v52, %v175_v58  ;;  %v182_v1 = vsel %vm181_vm7, %v512_v39, %v180_v59  ;;  %v194_v46 = vmul.f32 %v417_v40, %v523_v54  ;;  %v211_v59 = vsel %vm167_vm13, 2.8102264e-08, %v463_v62 }
  0x5e   :  { %v387_v61 = vadd.f32 -3.0, %v178_v60  ;;  %v185_v2 = vsel %vm183_vm8, %v184_v56, %v182_v1  ;;  %v189_v26 = vsel %vm188_vm10, %v516_v47, %v187_v21  ;;  %v249_v56 = vsel %vm165_vm9, 0.00021858087, %v467_v48 }
  0x5f   :  { %v388_v9 = vadd.f32 -3.0, %v185_v2  ;;  %v192_v31 = vsel %vm190_vm11, %v191_v18, %v189_v26  ;;  %v196_v55 = vsel %vm195_vm14, %v523_v54, %v194_v46  ;;  %v468_v1 = vmov -0.0076224613  }
  0x60   :  { %v540_v3 = vsel %vm164_vm6, %v383_v57, %v387_v61  ;;  %v389_v33 = vadd.f32 -3.0, %v192_v31  ;;  %v226_v57 = vsel %vm166_vm12, -3.5233877e-06, %v465_v19  ;;  %v199_v58 = vsel %vm197_vm15, %v198_v42, %v196_v55 }
  0x61   :  { %v216_v12 = vmul.f32 %v208_v63, %v540_v3  ;;  %v549_v13 = vsel %vm165_vm9, %v384_v0, %v388_v9  ;;  %v390_v0 = vadd.f32 -3.0, %v199_v58  ;;  %v260_v2 = vsel %vm164_vm6, -0.001253725, %v468_v1 }
  0x62   :  { %v217_v17 = vmul.f32 %v209_v11, %v549_v13  ;;  %v583_v41 = vsel %vm166_vm12, %v385_v25, %v389_v33  ;;  %v227_v26 = vsel %vm167_vm13, -3.5233877e-06, %v465_v19  ;;  %v239_v42 = vsel %vm167_vm13, -4.3915065e-06, %v466_v28 }
  0x63   :  { %v220_v16 = vadd.f32 %v216_v12, %v212_v8  ;;  %v218_v45 = vmul.f32 %v210_v34, %v583_v41  ;;  %v215_v8 = vsel %vm167_vm13, 3.4327394e-07, %v464_v7  ;;  %v612_v62 = vsel %vm167_vm13, %v386_v50, %v390_v0 }
  0x64   :  { %v221_v23 = vadd.f32 %v217_v17, %v213_v14  ;;  %v261_v14 = vsel %vm165_vm9, -0.001253725, %v468_v1  ;;  %v470_v34 = vmov 1.001674   ;;  %v251_v58 = vsel %vm167_vm13, 0.00021858087, %v467_v48 }
  0x65   :  { %v228_v22 = vmul.f32 %v220_v16, %v540_v3  ;;  %v222_v53 = vadd.f32 %v218_v45, %v214_v38  ;;  %v219_v16 = vmul.f32 %v211_v59, %v612_v62  ;;  %v316_v0 = vmul.f32 inf, %v494_v4 }
  0x66   :  { %v229_v30 = vmul.f32 %v221_v23, %v549_v13 }
  0x67   :  { %v232_v27 = vadd.f32 %v228_v22, %v224_v20  ;;  %v230_v63 = vmul.f32 %v222_v53, %v583_v41  ;;  %v469_v20 = vmov 0.0094388705   ;;  %v223_v22 = vadd.f32 %v219_v16, %v215_v8 }
  0x68   :  { %v233_v37 = vadd.f32 %v229_v30, %v225_v24  ;;  %v272_v21 = vsel %vm164_vm6, -0.0041776816, %v469_v20  ;;  %v308_v53 = vand.u32 2147483647, %v494_v4 }
  0x69   :  { %v240_v35 = vmul.f32 %v232_v27, %v540_v3  ;;  %v234_v12 = vadd.f32 %v230_v63, %v226_v57  ;;  %v273_v27 = vsel %vm165_vm9, -0.0041776816, %v469_v20  ;;  %v231_v30 = vmul.f32 %v223_v22, %v612_v62 }
  0x6a   :  { %v241_v44 = vmul.f32 %v233_v37, %v549_v13  ;;  %vm312_vm0 = vcmp.eq.f32.partialorder %v308_v53, 1.0 }
  0x6b   :  { %v244_v43 = vadd.f32 %v240_v35, %v236_v29  ;;  %v242_v18 = vmul.f32 %v234_v12, %v583_v41  ;;  %v250_v29 = vsel %vm166_vm12, 0.00021858087, %v467_v48  ;;  %v284_v35 = vsel %vm164_vm6, 0.24664073, %v470_v34 }
  0x6c   :  { %v245_v52 = vadd.f32 %v241_v44, %v237_v32  ;;  %v235_v37 = vadd.f32 %v231_v30, %v227_v26  ;;  %v262_v44 = vsel %vm166_vm12, -0.001253725, %v468_v1  ;;  %v317_v48 = vmul.f32 inf, %v496_v5 }
  0x6d   :  { %v252_v51 = vmul.f32 %v244_v43, %v540_v3  ;;  %v246_v25 = vadd.f32 %v242_v18, %v238_v15  ;;  %v285_v43 = vsel %vm165_vm9, 0.24664073, %v470_v34  ;;  %v263_v12 = vsel %vm167_vm13, -0.001253725, %v468_v1 }
  0x6e   :  { %v253_v61 = vmul.f32 %v245_v52, %v549_v13  ;;  %v243_v45 = vmul.f32 %v235_v37, %v612_v62  ;;  %v275_v1 = vsel %vm167_vm13, -0.0041776816, %v469_v20  ;;  %v287_v37 = vsel %vm167_vm13, 0.24664073, %v470_v34 }
  0x6f   :  { %v256_v60 = vadd.f32 %v252_v51, %v248_v49  ;;  %v254_v33 = vmul.f32 %v246_v25, %v583_v41  ;;  %v471_v51 = vmov 2.8329768  }
  0x70   :  { %v257_v11 = vadd.f32 %v253_v61, %v249_v56  ;;  %v296_v52 = vsel %vm164_vm6, 1.5014094, %v471_v51  ;;  %v247_v28 = vadd.f32 %v243_v45, %v239_v42  ;;  %v297_v59 = vsel %vm165_vm9, 1.5014094, %v471_v51  ;;  %v334_v45 = vld [vmem:[#allocation4 + $0x10] sm:$0xff] }
  0x71   :  { %v264_v9 = vmul.f32 %v256_v60, %v540_v3  ;;  %v258_v40 = vadd.f32 %v254_v33, %v250_v29  ;;  %v309_v60 = vand.u32 2147483647, %v496_v5  ;;  %v274_v61 = vsel %vm166_vm12, -0.0041776816, %v469_v20 }
  0x72   :  { %v265_v7 = vmul.f32 %v257_v11, %v549_v13  ;;  %v255_v36 = vmul.f32 %v247_v28, %v612_v62  ;;  %v298_v26 = vsel %vm166_vm12, 1.5014094, %v471_v51  ;;  %v311_v42 = vand.u32 2147483647, %v503_v10  ;;  %v335_v28 = vld [vmem:[#allocation4 + $0x18] sm:$0xff] }
  0x73   :  { %v268_v17 = vadd.f32 %v264_v9, %v260_v2  ;;  %v266_v50 = vmul.f32 %v258_v40, %v583_v41  ;;  %vm313_vm1 = vcmp.eq.f32.partialorder %v309_v60, 1.0 }
  0x74   :  { %v269_v24 = vadd.f32 %v265_v7, %v261_v14  ;;  %v259_v8 = vadd.f32 %v255_v36, %v251_v58  ;;  %v286_v14 = vsel %vm166_vm12, 0.24664073, %v470_v34  ;;  %vm315_vm3 = vcmp.eq.f32.partialorder %v311_v42, 1.0 }
  0x75   :  { %v276_v23 = vmul.f32 %v268_v17, %v540_v3  ;;  %v270_v57 = vadd.f32 %v266_v50, %v262_v44 }
  0x76   :  { %v277_v32 = vmul.f32 %v269_v24, %v549_v13  ;;  %v267_v15 = vmul.f32 %v259_v8, %v612_v62 }
  0x77   :  { %v280_v31 = vadd.f32 %v276_v23, %v272_v21  ;;  %v278_v2 = vmul.f32 %v270_v57, %v583_v41  ;;  %v332_v21 = vld [vmem:[#allocation4] sm:$0xff]  ;;  %v310_v23 = vand.u32 2147483647, %v498_v6 }
  0x78   :  { %v281_v38 = vadd.f32 %v277_v32, %v273_v27  ;;  %v271_v18 = vadd.f32 %v267_v15, %v263_v12 }
  0x79   :  { %v288_v19 = vmul.f32 %v280_v31, %v540_v3  ;;  %v282_v11 = vadd.f32 %v278_v2, %v274_v61  ;;  %vm314_vm2 = vcmp.eq.f32.partialorder %v310_v23, 1.0 }
  0x7a   :  { %v289_v49 = vmul.f32 %v281_v38, %v549_v13  ;;  %v279_v27 = vmul.f32 %v271_v18, %v612_v62 }
  0x7b   :  { %v292_v46 = vadd.f32 %v288_v19, %v284_v35  ;;  %v290_v17 = vmul.f32 %v282_v11, %v583_v41  ;;  %v318_v35 = vmul.f32 inf, %v498_v6 }
  0x7c   :  { %v293_v56 = vadd.f32 %v289_v49, %v285_v43  ;;  %v283_v32 = vadd.f32 %v279_v27, %v275_v1  ;;  %v319_v49 = vmul.f32 inf, %v503_v10 }
  0x7d   :  { %v300_v55 = vmul.f32 %v292_v46, %v540_v3  ;;  %v294_v22 = vadd.f32 %v290_v17, %v286_v14 }
  0x7e   :  { %v301_v3 = vmul.f32 %v293_v56, %v549_v13  ;;  %v291_v47 = vmul.f32 %v283_v32, %v612_v62 }
  0x7f   :  { %v304_v63 = vadd.f32 %v300_v55, %v296_v52  ;;  %v302_v29 = vmul.f32 %v294_v22, %v583_v41  ;;  %v299_v41 = vsel %vm167_vm13, 1.5014094, %v471_v51 }
  0x80   :  { %v305_v9 = vadd.f32 %v301_v3, %v297_v59  ;;  %v295_v38 = vadd.f32 %v291_v47, %v287_v37 }
  0x81   :  { %v320_v39 = vmul.f32 %v494_v4, %v304_v63  ;;  %v306_v33 = vadd.f32 %v302_v29, %v298_v26 }
  0x82   :  { %v321_v16 = vmul.f32 %v496_v5, %v305_v9  ;;  %v333_v5 = vld [vmem:[#allocation4 + $0x8] sm:$0xff]  ;;  %v303_v44 = vmul.f32 %v295_v38, %v612_v62 }
  0x83   :  { %v324_v13 = vsel %vm312_vm0, %v316_v0, %v320_v39  ;;  %v322_v19 = vmul.f32 %v498_v6, %v306_v33 }
  0x84   :  { %v328_v7 = vmul.f32 1.4142135, %v324_v13  ;;  %v325_v4 = vsel %vm313_vm1, %v317_v48, %v321_v16  ;;  %v307_v46 = vadd.f32 %v303_v44, %v299_v41 }
  0x85   :  { %v329_v25 = vmul.f32 1.4142135, %v325_v4  ;;  %v326_v40 = vsel %vm314_vm2, %v318_v35, %v322_v19 }
  0x86   :  { %v336_v24 = vmul.f32 0.05, %v328_v7  ;;  %v330_v43 = vmul.f32 1.4142135, %v326_v40  ;;  %v323_v6 = vmul.f32 %v503_v10, %v307_v46 }
  0x87   :  { %v337_v31 = vmul.f32 0.05, %v329_v25 }
  0x88   :  { %v340_v30 = vadd.f32 %v336_v24, %v332_v21  ;;  %v338_v34 = vmul.f32 0.05, %v330_v43  ;;  %v327_v52 = vsel %vm315_vm3, %v319_v49, %v323_v6 }
  0x89   :  { %v341_v20 = vadd.f32 %v337_v31, %v333_v5  ;;  %v331_v53 = vmul.f32 1.4142135, %v327_v52 }
  0x8a   :  { %344 = vst [vmem:[#allocation7] sm:$0xff] %v340_v30  ;;  %v342_v50 = vadd.f32 %v338_v34, %v334_v45 }
  0x8b   :  { %345 = vst [vmem:[#allocation7 + $0x8] sm:$0xff] %v341_v20  ;;  %v339_v54 = vmul.f32 0.05, %v331_v53 }
  0x8c   :  { %346 = vst [vmem:[#allocation7 + $0x10] sm:$0xff] %v342_v50 }
  0x8d   :  { %v343_v51 = vadd.f32 %v339_v54, %v335_v28 }
  0x8f   :  { %347 = vst [vmem:[#allocation7 + $0x18] sm:$0xff] %v343_v51 }
  0x90   :  { %449 = shalt.err (!%p446_p9)
}
  0x91   :  { %357 = dma.vmem_to_hbm [thread:$0]  %s355_s1, 512, %s695_s2, [#allocation6]  }
  0x92   :  { %460 = dma.done.wait [#allocation6], 512  }
  0x93   :  { %461 = vsyncadd [#allocation6], 4294966784 }
  0x94   :  { %361 = vsyncpa [#allocation5], 1 }
  0x95   :  { %362 = vsyncpa [#allocation6], 1 }

</bundles_post_ra>
